<compile_context>
chip_gen: v5e
topology: v5e:2x2
jax: 0.10.0
libtpu: 0.0.40
codegen_flags: <defaults>
</compile_context>

<pallas_src>
import functools

import jax
import jax.numpy as jnp
from jax.experimental import pallas as pl
from jax.experimental.pallas import tpu as pltpu


def _diag_gaussian_mean_kernel(x_ref, w_ref, b_ref, mean_ref, *, squash_mean):
    # Hot path: one MXU matmul per batch tile + bias (+ tanh), all in VMEM.
    # Inputs were pre-folded block-diagonally in the wrapper, so the output
    # block is already lane-dense (last dim = fold*num_outputs).
    mean = jnp.dot(x_ref[...], w_ref[...],
                   preferred_element_type=jnp.float32) + b_ref[...]
    if squash_mean:
        mean = jnp.tanh(mean)
    mean_ref[...] = mean.astype(mean_ref.dtype)


def diag_gaussian_forward(x, weight_t, bias, logstd, *, squash_mean,
                          block_x_rows=32768):
    """Forward of DiagGaussian.

    Returns (action_mean, action_std) — the parameters of the Normal
    distribution.  action_std has shape (1, num_outputs); it is independent of
    x and broadcasts against action_mean at the use site (sample / log_prob).
    """
    B, num_inputs = x.shape
    num_outputs = weight_t.shape[1]
    itemsize = x.dtype.itemsize

    # ---- lane-dense folding: pack `fold` batch rows into the lane axis ------
    if num_outputs < 128 and 128 % num_outputs == 0:
        fold = 128 // num_outputs
    else:
        fold = 1  # output already >= 128 wide (or awkward); plain matmul path

    B_pad = -(-B // fold) * fold                # pad so the fold reshape works
    if B_pad != B:
        x = jnp.pad(x, ((0, B_pad - B), (0, 0)))

    R = B_pad // fold                           # folded batch rows
    Kf = fold * num_inputs
    Nf = fold * num_outputs                     # == 128 on the folded path

    x_f = x.reshape(R, Kf)                      # free: row-major contiguous
    if fold > 1:
        eye = jnp.eye(fold, dtype=weight_t.dtype)
        # kron(I_fold, weight_t): block-diagonal (Kf, Nf) weight.
        w_f = jnp.einsum("fg,io->figo", eye, weight_t).reshape(Kf, Nf)
        b_f = jnp.tile(bias.reshape(1, num_outputs), (1, fold))
    else:
        w_f = weight_t
        b_f = bias.reshape(1, num_outputs)

    # ---- batch tiling: big tiles, >=2 grid steps when possible (v7x) -------
    target_blk = max(8, (block_x_rows // fold) // 8 * 8)   # folded rows / step
    if R <= target_blk:
        if R >= 16:
            # Split into >=2 "parallel" steps so both v7x TensorCores work.
            blk = max(8, (-(-R // 2) + 7) // 8 * 8)
        else:
            blk = R                                         # full-extent block
    else:
        blk = target_blk
    grid = (pl.cdiv(R, blk),)

    # Scoped VMEM: double-buffered x tile + out tile, resident W/b, headroom.
    vmem_bytes = (2 * blk * (Kf + Nf) * itemsize
                  + 2 * (Kf * Nf + Nf) * itemsize + (4 << 20))
    vmem_bytes = int(min(max(vmem_bytes, 16 << 20), 64 << 20))

    flops = 2 * B_pad * num_inputs * num_outputs
    bytes_accessed = (R * Kf + Kf * Nf + Nf + R * Nf) * itemsize
    transcendentals = B_pad * num_outputs if squash_mean else 0

    kernel = functools.partial(_diag_gaussian_mean_kernel,
                               squash_mean=squash_mean)

    mean_folded = pl.pallas_call(
        kernel,
        out_shape=jax.ShapeDtypeStruct((R, Nf), x.dtype),
        grid=grid,
        in_specs=[
            pl.BlockSpec((blk, Kf), lambda i: (i, 0)),
            pl.BlockSpec((Kf, Nf), lambda i: (0, 0)),   # resident weight
            pl.BlockSpec((1, Nf), lambda i: (0, 0)),    # resident bias
        ],
        out_specs=pl.BlockSpec((blk, Nf), lambda i: (i, 0)),
        compiler_params=pltpu.CompilerParams(
            dimension_semantics=("parallel",),
            vmem_limit_bytes=vmem_bytes),
        cost_estimate=pl.CostEstimate(
            flops=flops,
            transcendentals=transcendentals,
            bytes_accessed=bytes_accessed),
    )(x_f, w_f, b_f)

    action_mean = mean_folded.reshape(B_pad, num_outputs)[:B]

    # std does not depend on x: keep it (1, num_outputs), broadcast lazily.
    action_std = jnp.exp(logstd)
    return action_mean, action_std


def init_diag_gaussian_params(key, num_inputs, num_outputs, std_init):
    """Mirror the PyTorch module's __init__: orthogonal(gain=1) Linear weight,
       zero bias, logstd filled with std_init."""
    w = jax.nn.initializers.orthogonal(scale=1.0)(
        key, (num_outputs, num_inputs), jnp.float32)   # torch Linear weight shape
    weight_t = jnp.transpose(w)                        # (num_inputs, num_outputs)
    bias = jnp.zeros((1, num_outputs), jnp.float32)
    logstd = jnp.full((1, num_outputs), float(std_init), jnp.float32)
    return weight_t, bias, logstd


if __name__ == "__main__":
    key = jax.random.PRNGKey(0)
    k_param, k_x1, k_x2, k_x3 = jax.random.split(key, 4)

    num_inputs = 32
    num_outputs = 8
    std_init = -1.0

    weight_t, bias, logstd = init_diag_gaussian_params(
        k_param, num_inputs, num_outputs, std_init)

    def check(batch, kx, squash_mean):
        x = jax.random.normal(kx, (batch, num_inputs), jnp.float32)
        mean, std = diag_gaussian_forward(
            x, weight_t, bias, logstd, squash_mean=squash_mean)
        jax.block_until_ready((mean, std))
        ref_mean = x @ weight_t + bias
        if squash_mean:
            ref_mean = jnp.tanh(ref_mean)
        ref_std = jnp.exp(logstd)
        assert mean.shape == (batch, num_outputs)
        assert std.shape == (1, num_outputs)
        assert jnp.allclose(mean, ref_mean, atol=1e-5, rtol=1e-5)
        assert jnp.allclose(std, ref_std, atol=1e-6, rtol=1e-6)
        # std broadcasts against the mean exactly like the torch expand_as.
        assert jnp.broadcast_to(std, mean.shape).shape == mean.shape

    # Lane-dense folded path; batch a multiple of fold (128 // 8 = 16).
    check(16, k_x1, squash_mean=True)
    # Batch NOT a multiple of fold -> wrapper zero-pads and slices (no fallback).
    check(12, k_x2, squash_mean=True)
    # squash_mean=False branch (plain Linear head).
    check(16, k_x3, squash_mean=False)

    # TODO(synk): FixedNormal itself (sample/log_prob/entropy) is not a kernel;
    # the kernel returns its (mean, std) parameters.
    print("KERNEL_OK")
</pallas_src>

<mosaic_0001>
module attributes {stable_mosaic.version = 11 : i64} {
  func.func @_diag_gaussian_mean_kernel(%arg0: i32, %arg1: memref<1x512xf32, #tpu.memory_space<vmem>>, %arg2: memref<512x128xf32, #tpu.memory_space<vmem>>, %arg3: memref<1x128xf32, #tpu.memory_space<vmem>>, %arg4: memref<1x128xf32, #tpu.memory_space<vmem>>) attributes {dimension_semantics = [#tpu.dimension_semantics<parallel>], iteration_bounds = array<i64: 1>, scalar_prefetch = 0 : i64, scratch_operands = 0 : i64, tpu.core_type = #tpu.core_type<tc>, window_params = [{transform_indices = @transform_0, window_bounds = array<i64: 1, 512>}, {pipeline_mode = #tpu.pipeline_mode<synchronous>, transform_indices = @transform_1, window_bounds = array<i64: 512, 128>}, {pipeline_mode = #tpu.pipeline_mode<synchronous>, transform_indices = @transform_2, window_bounds = array<i64: 1, 128>}, {transform_indices = @transform_3, window_bounds = array<i64: 1, 128>}]} {
    %c0 = arith.constant 0 : index
    %c0_0 = arith.constant 0 : index
    %0 = vector.load %arg1[%c0, %c0_0] : memref<1x512xf32, #tpu.memory_space<vmem>>, vector<1x512xf32>
    %c0_1 = arith.constant 0 : index
    %c0_2 = arith.constant 0 : index
    %1 = vector.load %arg2[%c0_1, %c0_2] : memref<512x128xf32, #tpu.memory_space<vmem>>, vector<512x128xf32>
    %cst = arith.constant dense<0.000000e+00> : vector<1x128xf32>
    %2 = tpu.matmul %0, %1, %cst {dimension_numbers = #tpu.dot_dimension_numbers<[1], [0], [0], [1], [0, 0, 1, 1], [], []>} : vector<1x512xf32>, vector<512x128xf32>, vector<1x128xf32> -> vector<1x128xf32>
    %c0_3 = arith.constant 0 : index
    %c0_4 = arith.constant 0 : index
    %3 = vector.load %arg3[%c0_3, %c0_4] : memref<1x128xf32, #tpu.memory_space<vmem>>, vector<1x128xf32>
    %4 = arith.addf %2, %3 : vector<1x128xf32>
    %5 = math.tanh %4 : vector<1x128xf32>
    %c0_5 = arith.constant 0 : index
    %c0_6 = arith.constant 0 : index
    %6 = vector.load %arg4[%c0_5, %c0_6] : memref<1x128xf32, #tpu.memory_space<vmem>>, vector<1x128xf32>
    tpu.vector_store %arg4[%c0_5, %c0_6], %5 {strides = array<i32>} : memref<1x128xf32, #tpu.memory_space<vmem>>, vector<1x128xf32>,
    return
  }
  func.func @transform_0(%arg0: i32) -> (i32, i32) {
    %c0_i32 = arith.constant 0 : i32
    %c0_i32_0 = arith.constant 0 : i32
    return %arg0, %c0_i32 : i32, i32
  }
  func.func @transform_1(%arg0: i32) -> (i32, i32) {
    %c0_i32 = arith.constant 0 : i32
    %c0_i32_0 = arith.constant 0 : i32
    %c0_i32_1 = arith.constant 0 : i32
    return %c0_i32, %c0_i32_0 : i32, i32
  }
  func.func @transform_2(%arg0: i32) -> (i32, i32) {
    %c0_i32 = arith.constant 0 : i32
    %c0_i32_0 = arith.constant 0 : i32
    %c0_i32_1 = arith.constant 0 : i32
    return %c0_i32, %c0_i32_0 : i32, i32
  }
  func.func @transform_3(%arg0: i32) -> (i32, i32) {
    %c0_i32 = arith.constant 0 : i32
    %c0_i32_0 = arith.constant 0 : i32
    return %arg0, %c0_i32 : i32, i32
  }
}

</mosaic_0001>

<bundles_post_ra>
// kernel: tpu_custom_call.1
= control target key start
LH: loop header
LB: loop body
LE: loop exit
PB: predicated region body
PF: predicated region fallthrough
CT: control target
= control target key end

     0   :  { %8 = vsyncpa [#allocation3], 0  ;;  %s342_s0 = inlined_call_operand.hbm [shape: f32[1,512], index: 0, kind: input, shape index: {}]   ;;  %s343_s1 = inlined_call_operand.hbm [shape: f32[512,128], index: 1, kind: input, shape index: {}]   ;;  %s344_s2 = inlined_call_operand.vmem [shape: f32[1,128], index: 2, kind: input, shape index: {}]   ;;  %s345_s3 = inlined_call_operand.hbm [shape: f32[1,128], index: 3, kind: output, shape index: {}]  }
   0x1   :  { %9 = vsyncpa [#allocation6], 0 }
   0x2   :  { %10 = vsyncpa [#allocation4], 0  ;;  %s16_s14 = sshll.u32 %s342_s0, 4  ;;  %s305_s15 = smov [#allocation2]   ;;  %s17_s14 = int_to_ptr.hbm [resolvable:$true] %s16_s14 }
   0x3   :  { %s18_s16 = sshll.u32 %s305_s15, 4  ;;  %s26_s19 = sshll.u32 %s343_s1, 4  ;;  %s19_s16 = int_to_ptr.vmem [resolvable:$true] %s18_s16  ;;  %s27_s19 = int_to_ptr.hbm [resolvable:$true] %s26_s19 }
   0x4   :  { %21 = dma.hbm_to_vmem [thread:$0]  %s17_s14, 64, %s19_s16, [#allocation3]  }
   0x5   :  { %s306_s20 = smov [#allocation5]   ;;  %s307_s22 = smov 128  }
   0x6   :  { %s28_s21 = sshll.u32 %s306_s20, 4  ;;  %s308_s23 = smov 8   ;;  %s29_s21 = int_to_ptr.vmem [resolvable:$true] %s28_s21 }
   0x7   :  { %34 = dma.hbm_to_vmem [thread:$0]  %s27_s19, 8192, %s29_s21, [#allocation6], %s307_s22, %s307_s22, %s308_s23  }
   0x8   :  { %299 = dma.done.wait [#allocation3], 64  }
   0x9   :  { %300 = vsyncadd [#allocation3], 4294967232 }
   0xa   :  { %301 = dma.done.wait [#allocation6], 8192  }
   0xb   :  { %302 = vsyncadd [#allocation6], 4294959104  ;;  %v93_v0 = vld [vmem:[#allocation5 + $0x178] sm:$0xff]  ;;  %v92_v2 = vld [vmem:[#allocation5 + $0x170] sm:$0xff]  ;;  %s309_s24 = smov [#allocation7]   ;;  %s209_s28 = sshll.u32 %s345_s3, 4  ;;  %s210_s28 = int_to_ptr.hbm [resolvable:$true] %s209_s28 }
   0xc   :  { %v61_v1 = vld [vmem:[#allocation5 + $0x78] sm:$0xff]  ;;  %160 = vmatpush.msra.mxu2 %v93_v0  ;;  %v60_v4 = vld [vmem:[#allocation5 + $0x70] sm:$0xff]  ;;  %v91_v6 = vld [vmem:[#allocation5 + $0x168] sm:$0xff]  ;;  %s207_s25 = sshll.u32 %s309_s24, 4  ;;  %s208_s25 = int_to_ptr.vmem [resolvable:$true] %s207_s25 }
   0xd   :  { %120 = vmatpush.msra.mxu0 %v61_v1  ;;  %v109_v3 = vld [vmem:[#allocation5 + $0x1f8] sm:$0xff]  ;;  %v108_v7 = vld [vmem:[#allocation5 + $0x1f0] sm:$0xff]  ;;  %v59_v8 = vld [vmem:[#allocation5 + $0x68] sm:$0xff] }
   0xe   :  { %v77_v5 = vld [vmem:[#allocation5 + $0xf8] sm:$0xff]  ;;  %180 = vmatpush.msra.mxu3 %v109_v3  ;;  %161 = vmatpush.msra.mxu2 %v92_v2  ;;  %v76_v9 = vld [vmem:[#allocation5 + $0xf0] sm:$0xff]  ;;  %v107_v10 = vld [vmem:[#allocation5 + $0x1e8] sm:$0xff] }
   0xf   :  { %140 = vmatpush.msra.mxu1 %v77_v5  ;;  %121 = vmatpush.msra.mxu0 %v60_v4  ;;  %v90_v11 = vld [vmem:[#allocation5 + $0x160] sm:$0xff]  ;;  %v75_v13 = vld [vmem:[#allocation5 + $0xe8] sm:$0xff]  ;;  %v89_v16 = vld [vmem:[#allocation5 + $0x158] sm:$0xff] }
  0x10   :  { %181 = vmatpush.msra.mxu3 %v108_v7  ;;  %v58_v12 = vld [vmem:[#allocation5 + $0x60] sm:$0xff]  ;;  %162 = vmatpush.msra.mxu2 %v91_v6  ;;  %v57_v17 = vld [vmem:[#allocation5 + $0x58] sm:$0xff]  ;;  %v88_v20 = vld [vmem:[#allocation5 + $0x150] sm:$0xff] }
  0x11   :  { %141 = vmatpush.msra.mxu1 %v76_v9  ;;  %122 = vmatpush.msra.mxu0 %v59_v8  ;;  %v106_v14 = vld [vmem:[#allocation5 + $0x1e0] sm:$0xff]  ;;  %v105_v18 = vld [vmem:[#allocation5 + $0x1d8] sm:$0xff]  ;;  %v56_v21 = vld [vmem:[#allocation5 + $0x50] sm:$0xff] }
  0x12   :  { %v74_v15 = vld [vmem:[#allocation5 + $0xe0] sm:$0xff]  ;;  %182 = vmatpush.msra.mxu3 %v107_v10  ;;  %163 = vmatpush.msra.mxu2 %v90_v11  ;;  %v73_v19 = vld [vmem:[#allocation5 + $0xd8] sm:$0xff]  ;;  %v104_v22 = vld [vmem:[#allocation5 + $0x1d0] sm:$0xff] }
  0x13   :  { %142 = vmatpush.msra.mxu1 %v75_v13  ;;  %123 = vmatpush.msra.mxu0 %v58_v12  ;;  %v72_v23 = vld [vmem:[#allocation5 + $0xd0] sm:$0xff]  ;;  %v87_v24 = vld [vmem:[#allocation5 + $0x148] sm:$0xff]  ;;  %v86_v28 = vld [vmem:[#allocation5 + $0x140] sm:$0xff] }
  0x14   :  { %183 = vmatpush.msra.mxu3 %v106_v14  ;;  %164 = vmatpush.msra.mxu2 %v89_v16  ;;  %v55_v25 = vld [vmem:[#allocation5 + $0x48] sm:$0xff]  ;;  %v54_v29 = vld [vmem:[#allocation5 + $0x40] sm:$0xff]  ;;  %v85_v32 = vld [vmem:[#allocation5 + $0x138] sm:$0xff] }
  0x15   :  { %143 = vmatpush.msra.mxu1 %v74_v15  ;;  %124 = vmatpush.msra.mxu0 %v57_v17  ;;  %v103_v26 = vld [vmem:[#allocation5 + $0x1c8] sm:$0xff]  ;;  %v102_v30 = vld [vmem:[#allocation5 + $0x1c0] sm:$0xff]  ;;  %v53_v33 = vld [vmem:[#allocation5 + $0x38] sm:$0xff] }
  0x16   :  { %184 = vmatpush.msra.mxu3 %v105_v18  ;;  %165 = vmatpush.msra.mxu2 %v88_v20  ;;  %v71_v27 = vld [vmem:[#allocation5 + $0xc8] sm:$0xff]  ;;  %v70_v31 = vld [vmem:[#allocation5 + $0xc0] sm:$0xff]  ;;  %v101_v34 = vld [vmem:[#allocation5 + $0x1b8] sm:$0xff] }
  0x17   :  { %144 = vmatpush.msra.mxu1 %v73_v19  ;;  %125 = vmatpush.msra.mxu0 %v56_v21  ;;  %v69_v35 = vld [vmem:[#allocation5 + $0xb8] sm:$0xff]  ;;  %v84_v36 = vld [vmem:[#allocation5 + $0x130] sm:$0xff]  ;;  %v83_v40 = vld [vmem:[#allocation5 + $0x128] sm:$0xff] }
  0x18   :  { %185 = vmatpush.msra.mxu3 %v104_v22  ;;  %166 = vmatpush.msra.mxu2 %v87_v24  ;;  %v52_v37 = vld [vmem:[#allocation5 + $0x30] sm:$0xff]  ;;  %v51_v41 = vld [vmem:[#allocation5 + $0x28] sm:$0xff]  ;;  %v82_v44 = vld [vmem:[#allocation5 + $0x120] sm:$0xff] }
  0x19   :  { %145 = vmatpush.msra.mxu1 %v72_v23  ;;  %126 = vmatpush.msra.mxu0 %v55_v25  ;;  %v100_v38 = vld [vmem:[#allocation5 + $0x1b0] sm:$0xff]  ;;  %v99_v42 = vld [vmem:[#allocation5 + $0x1a8] sm:$0xff]  ;;  %v50_v45 = vld [vmem:[#allocation5 + $0x20] sm:$0xff] }
  0x1a   :  { %186 = vmatpush.msra.mxu3 %v103_v26  ;;  %167 = vmatpush.msra.mxu2 %v86_v28  ;;  %v68_v39 = vld [vmem:[#allocation5 + $0xb0] sm:$0xff]  ;;  %v67_v43 = vld [vmem:[#allocation5 + $0xa8] sm:$0xff]  ;;  %v98_v46 = vld [vmem:[#allocation5 + $0x1a0] sm:$0xff] }
  0x1b   :  { %146 = vmatpush.msra.mxu1 %v71_v27  ;;  %127 = vmatpush.msra.mxu0 %v54_v29  ;;  %v66_v47 = vld [vmem:[#allocation5 + $0xa0] sm:$0xff]  ;;  %v81_v48 = vld [vmem:[#allocation5 + $0x118] sm:$0xff]  ;;  %v80_v52 = vld [vmem:[#allocation5 + $0x110] sm:$0xff] }
  0x1c   :  { %187 = vmatpush.msra.mxu3 %v102_v30  ;;  %168 = vmatpush.msra.mxu2 %v85_v32  ;;  %v49_v49 = vld [vmem:[#allocation5 + $0x18] sm:$0xff]  ;;  %v48_v53 = vld [vmem:[#allocation5 + $0x10] sm:$0xff]  ;;  %v79_v57 = vld [vmem:[#allocation5 + $0x108] sm:$0xff] }
  0x1d   :  { %147 = vmatpush.msra.mxu1 %v70_v31  ;;  %128 = vmatpush.msra.mxu0 %v53_v33  ;;  %v97_v50 = vld [vmem:[#allocation5 + $0x198] sm:$0xff]  ;;  %v96_v54 = vld [vmem:[#allocation5 + $0x190] sm:$0xff]  ;;  %v47_v58 = vld [vmem:[#allocation5 + $0x8] sm:$0xff] }
  0x1e   :  { %188 = vmatpush.msra.mxu3 %v101_v34  ;;  %169 = vmatpush.msra.mxu2 %v84_v36  ;;  %v65_v51 = vld [vmem:[#allocation5 + $0x98] sm:$0xff]  ;;  %v64_v55 = vld [vmem:[#allocation5 + $0x90] sm:$0xff]  ;;  %v95_v59 = vld [vmem:[#allocation5 + $0x188] sm:$0xff] }
  0x1f   :  { %148 = vmatpush.msra.mxu1 %v69_v35  ;;  %129 = vmatpush.msra.mxu0 %v52_v37  ;;  %v45_v56 = vld [vmem:[#allocation2] sm:$0xf]  ;;  %v63_v60 = vld [vmem:[#allocation5 + $0x88] sm:$0xff]  ;;  %v78_v61 = vld [vmem:[#allocation5 + $0x100] sm:$0xff] }
  0x20   :  { %189 = vmatpush.msra.mxu3 %v100_v38  ;;  %170 = vmatpush.msra.mxu2 %v83_v40  ;;  %v114_v62 = vperm.slane %v45_v56, 2  ;;  %v46_v63 = vld [vmem:[#allocation5] sm:$0xff]  ;;  %v112_v1 = vperm.slane %v45_v56, 0  ;;  %v115_v2 = vperm.slane %v45_v56, 3  ;;  %v113_v4 = vperm.slane %v45_v56, 1 }
  0x21   :  { %149 = vmatpush.msra.mxu1 %v68_v39  ;;  %130 = vmatpush.msra.mxu0 %v51_v41  ;;  %v94_v0 = vld [vmem:[#allocation5 + $0x180] sm:$0xff]  ;;  %v110_v5 = vld [vmem:[%s344_s2] sm:$0x1] }
  0x22   :  { %190 = vmatpush.msra.mxu3 %v99_v42  ;;  %171 = vmatpush.msra.mxu2 %v82_v44  ;;  %v62_v3 = vld [vmem:[#allocation5 + $0x80] sm:$0xff] }
  0x23   :  { %150 = vmatpush.msra.mxu1 %v67_v43  ;;  %131 = vmatpush.msra.mxu0 %v50_v45 }
  0x24   :  { %191 = vmatpush.msra.mxu3 %v98_v46  ;;  %172 = vmatpush.msra.mxu2 %v81_v48 }
  0x25   :  { %151 = vmatpush.msra.mxu1 %v66_v47  ;;  %132 = vmatpush.msra.mxu0 %v49_v49 }
  0x26   :  { %192 = vmatpush.msra.mxu3 %v97_v50  ;;  %173 = vmatpush.msra.mxu2 %v80_v52 }
  0x27   :  { %152 = vmatpush.msra.mxu1 %v65_v51  ;;  %133 = vmatpush.msra.mxu0 %v48_v53 }
  0x28   :  { %193 = vmatpush.msra.mxu3 %v96_v54  ;;  %174 = vmatpush.msra.mxu2 %v79_v57 }
  0x29   :  { %153 = vmatpush.msra.mxu1 %v64_v55  ;;  %134 = vmatpush.msra.mxu0 %v47_v58 }
  0x2a   :  { %194 = vmatpush.msra.mxu3 %v95_v59  ;;  %175 = vmatpush.msra.mxu2 %v78_v61 }
  0x2b   :  { %154 = vmatpush.msra.mxu1 %v63_v60  ;;  %135 = vmatpush.msra.mxu0 %v46_v63 }
  0x2c   :  { %176 = vmatmul.f32.vlgmr.msra.gmra.mxu2 %v114_v62  ;;  %195 = vmatpush.msra.mxu3 %v94_v0 }
  0x2d   :  { %136 = vmatmul.f32.vlgmr.msra.gmra.mxu0 %v112_v1  ;;  %196 = vmatmul.f32.vlgmr.msra.gmra.mxu3 %v115_v2 }
  0x2e   :  { %155 = vmatpush.msra.mxu1 %v62_v3 }
  0x2f   :  { %156 = vmatmul.f32.vlgmr.msra.gmra.mxu1 %v113_v4 }
  0xaa   :  { %v137_v6 = vpop.f32.mrf.mxu0 }
  0xab   :  { %v138_v7 = vadd.f32 %v137_v6, %v110_v5 }
  0xac   :  { %v157_v8 = vpop.f32.mrf.mxu1 }
  0xad   :  { %v158_v9 = vadd.f32 %v157_v8, %v138_v7 }
  0xaf   :  { %v177_v10 = vpop.f32.mrf.mxu2 }
  0xb0   :  { %v178_v11 = vadd.f32 %v177_v10, %v158_v9  ;;  %v197_v12 = vpop.f32.mrf.mxu3 }
  0xb2   :  { %v198_v13 = vadd.f32 %v197_v12, %v178_v11 }
  0xb4   :  { %225 = vtanh.f32 %v198_v13 }
  0xba   :  { %v226_v14 = vpop.eup %225 }
  0xbb   :  { %201 = vst [vmem:[#allocation7] sm:$0x1] %v226_v14 }
  0xbc   :  { %212 = dma.vmem_to_hbm [thread:$0]  %s208_s25, 16, %s210_s28, [#allocation4]  }
  0xbd   :  { %303 = dma.done.wait [#allocation4], 16  }
  0xbe   :  { %304 = vsyncadd [#allocation4], 4294967280 }
  0xbf   :  { %217 = vsyncpa [#allocation3], 1 }
  0xc0   :  { %218 = vsyncpa [#allocation6], 1 }
  0xc1   :  { %219 = vsyncpa [#allocation4], 1 }

</bundles_post_ra>
